<compile_context>
chip_gen: v6e
topology: v6e:2x2x1
jax: 0.10.0
libtpu: 0.0.40
codegen_flags: <defaults>
</compile_context>

<pallas_src>
import functools

import jax
import jax.numpy as jnp
from jax import lax
from jax.experimental import pallas as pl
from jax.experimental.pallas import tpu as pltpu

LANES = 128
SUBLANES = 8
MAX_BLOCK_ROWS = 2048  # 2048*128*4B = 1 MiB per f32 block; fits default scoped VMEM everywhere


def _pow_modulator(base, gamma):
    """base**gamma with small integer gammas unrolled to multiplies (no EUP pow)."""
    g = float(gamma)
    if g == 0.0:
        return jnp.ones_like(base)
    if g.is_integer() and 1.0 <= g <= 8.0:
        r = base
        for _ in range(int(g) - 1):
            r = r * base
        return r
    # Non-integer gamma: pow lowers to exp(g*log(.)); clamp base >= 0 for robustness.
    return jnp.maximum(base, 0.0) ** g


def _focal_elementwise(x, t, *, alpha, gamma, logits):
    """Per-element focal loss in f32 (matches PyTorch semantics)."""
    if logits:
        # BCEWithLogits: max(x,0) - x*t + log(1 + exp(-|x|))
        bce = jnp.maximum(x, 0.0) - x * t + jnp.log1p(jnp.exp(-jnp.abs(x)))
    else:
        # PyTorch binary_cross_entropy clamps log outputs at -100
        log_p = jnp.maximum(jnp.log(x), -100.0)
        log_1mp = jnp.maximum(jnp.log(1.0 - x), -100.0)
        bce = -(t * log_p + (1.0 - t) * log_1mp)
    pt = jnp.exp(-bce)
    return alpha * _pow_modulator(1.0 - pt, gamma) * bce


def _focal_sum_kernel(x_ref, t_ref, out_ref, acc_ref, *, alpha, gamma, logits,
                      n_total, block_rows, blocks_per_chunk, needs_mask):
    """Grid (P, blocks_per_chunk): P parallel chunks, inner reduction axis."""
    i = pl.program_id(1)

    @pl.when(i == 0)
    def _():
        acc_ref[...] = jnp.zeros_like(acc_ref)

    fl = _focal_elementwise(
        x_ref[...].astype(jnp.float32),
        t_ref[...].astype(jnp.float32),
        alpha=alpha, gamma=gamma, logits=logits)

    if needs_mask:
        block_idx = pl.program_id(0) * blocks_per_chunk + i
        row_ids = lax.broadcasted_iota(jnp.int32, fl.shape, 0)
        lane_ids = lax.broadcasted_iota(jnp.int32, fl.shape, 1)
        gidx = (block_idx * block_rows + row_ids) * LANES + lane_ids
        fl = jnp.where(gidx < n_total, fl, 0.0)

    # Pure VPU vector accumulation; no per-step cross-lane reduction.
    acc_ref[...] += fl

    @pl.when(i == blocks_per_chunk - 1)
    def _():
        # One sublane-group reduction per chunk -> (8, 128) partial sums.
        out_ref[...] = acc_ref[...].reshape(
            block_rows // SUBLANES, SUBLANES, LANES).sum(axis=0)


def _focal_elem_kernel(x_ref, t_ref, o_ref, *, alpha, gamma, logits):
    fl = _focal_elementwise(
        x_ref[...].astype(jnp.float32),
        t_ref[...].astype(jnp.float32),
        alpha=alpha, gamma=gamma, logits=logits)
    o_ref[...] = fl.astype(o_ref.dtype)


def _pack_2d(a, pad_value, rows_padded):
    """Flatten to (rows_padded, 128); skip the pad pass when already aligned."""
    flat = a.reshape(-1)
    total = rows_padded * LANES
    if total != flat.shape[0]:
        flat = jnp.pad(flat, (0, total - flat.shape[0]), constant_values=pad_value)
    return flat.reshape(rows_padded, LANES)


def focal_loss(inputs, targets, *, alpha=1.0, gamma=2.0, logits=False, reduce=True,
               block_rows=None):
    """Pallas TPU focal loss.  inputs/targets: any shape (e.g. NCHW), any float dtype."""
    orig_shape = inputs.shape
    n = int(inputs.size)
    rows = -(-n // LANES)

    if block_rows is None:
        block_rows = MAX_BLOCK_ROWS
    block_rows = min(block_rows, -(-rows // SUBLANES) * SUBLANES)
    block_rows = max(SUBLANES, (block_rows // SUBLANES) * SUBLANES)
    num_blocks = -(-rows // block_rows)

    pad_x = 0.0 if logits else 0.5  # safe values under log()
    pad_t = 0.5

    if reduce:
        # Leading 'parallel' axis so v7x's two TensorCores each reduce a chunk.
        P = 2 if num_blocks >= 2 else 1
        num_blocks = -(-num_blocks // P) * P
        blocks_per_chunk = num_blocks // P
        rows_padded = num_blocks * block_rows
        needs_mask = (rows_padded * LANES) != n

        x2 = _pack_2d(inputs, pad_x, rows_padded)
        t2 = _pack_2d(targets, pad_t, rows_padded)

        in_spec = pl.BlockSpec((block_rows, LANES),
                               lambda p, i: (p * blocks_per_chunk + i, 0))
        kern = functools.partial(
            _focal_sum_kernel, alpha=float(alpha), gamma=float(gamma),
            logits=bool(logits), n_total=n, block_rows=block_rows,
            blocks_per_chunk=blocks_per_chunk, needs_mask=needs_mask)

        partials = pl.pallas_call(
            kern,
            out_shape=jax.ShapeDtypeStruct((P * SUBLANES, LANES), jnp.float32),
            grid_spec=pltpu.PrefetchScalarGridSpec(
                num_scalar_prefetch=0,
                grid=(P, blocks_per_chunk),
                in_specs=[in_spec, in_spec],
                out_specs=pl.BlockSpec((SUBLANES, LANES), lambda p, i: (p, 0)),
                scratch_shapes=[pltpu.VMEM((block_rows, LANES), jnp.float32)],
            ),
            compiler_params=pltpu.CompilerParams(
                dimension_semantics=("parallel", "arbitrary")),
        )(x2, t2)
        return jnp.sum(partials) / jnp.float32(n)
    else:
        rows_padded = num_blocks * block_rows
        x2 = _pack_2d(inputs, pad_x, rows_padded)
        t2 = _pack_2d(targets, pad_t, rows_padded)

        tile_spec = pl.BlockSpec((block_rows, LANES), lambda i: (i, 0))
        kern = functools.partial(
            _focal_elem_kernel, alpha=float(alpha), gamma=float(gamma),
            logits=bool(logits))

        out2 = pl.pallas_call(
            kern,
            out_shape=jax.ShapeDtypeStruct((rows_padded, LANES), jnp.float32),
            grid_spec=pltpu.PrefetchScalarGridSpec(
                num_scalar_prefetch=0,
                grid=(num_blocks,),
                in_specs=[tile_spec, tile_spec],
                out_specs=tile_spec,
            ),
            compiler_params=pltpu.CompilerParams(
                dimension_semantics=("parallel",)),
        )(x2, t2)
        return out2.reshape(-1)[:n].reshape(orig_shape)


def _focal_loss_ref(inputs, targets, *, alpha=1.0, gamma=2.0, logits=False, reduce=True):
    fl = _focal_elementwise(inputs.astype(jnp.float32), targets.astype(jnp.float32),
                            alpha=alpha, gamma=gamma, logits=logits)
    return jnp.mean(fl) if reduce else fl


if __name__ == "__main__":
    key = jax.random.PRNGKey(0)
    k1, k2, k3, k4 = jax.random.split(key, 4)

    # FocalLoss with default logits=False expects probabilities in (0, 1).
    shape = (2, 4, 16, 16)
    inputs = jax.random.uniform(k1, shape, jnp.float32, minval=0.01, maxval=0.99)
    targets = jax.random.uniform(k2, shape, jnp.float32, minval=0.0, maxval=1.0)

    # Default module config: alpha=1, gamma=2, logits=False, reduce=True
    loss = jax.block_until_ready(
        focal_loss(inputs, targets, alpha=1.0, gamma=2.0, logits=False, reduce=True))
    ref = _focal_loss_ref(inputs, targets, alpha=1.0, gamma=2.0, logits=False, reduce=True)
    assert jnp.allclose(loss, ref, atol=1e-4, rtol=1e-4), (loss, ref)

    # logits=True path (BCEWithLogits).
    raw = jax.random.normal(k3, shape, jnp.float32)
    loss_l = jax.block_until_ready(focal_loss(raw, targets, logits=True, reduce=True))
    ref_l = _focal_loss_ref(raw, targets, logits=True, reduce=True)
    assert jnp.allclose(loss_l, ref_l, atol=1e-4, rtol=1e-4), (loss_l, ref_l)

    # reduce=False elementwise path.
    fl_map = jax.block_until_ready(focal_loss(inputs, targets, reduce=False))
    ref_map = _focal_loss_ref(inputs, targets, reduce=False)
    assert fl_map.shape == shape
    assert jnp.allclose(fl_map, ref_map, atol=1e-4, rtol=1e-4)

    # Ragged size + multi-block + two-chunk partial sums (exercises in-kernel
    # masking and the 'parallel' axis at a small shape by shrinking block_rows).
    shape2 = (2, 4, 16, 17)
    inputs2 = jax.random.uniform(k4, shape2, jnp.float32, minval=0.01, maxval=0.99)
    targets2 = jax.random.uniform(k2, shape2, jnp.float32, minval=0.0, maxval=1.0)
    loss2 = jax.block_until_ready(
        focal_loss(inputs2, targets2, reduce=True, block_rows=8))
    ref2 = _focal_loss_ref(inputs2, targets2, reduce=True)
    assert jnp.allclose(loss2, ref2, atol=1e-4, rtol=1e-4), (loss2, ref2)

    print("KERNEL_OK")
</pallas_src>

<mosaic_0001>
module attributes {stable_mosaic.version = 11 : i64} {
  func.func @_focal_sum_kernel(%arg0: i32, %arg1: i32, %arg2: memref<16x128xf32, #tpu.memory_space<vmem>>, %arg3: memref<16x128xf32, #tpu.memory_space<vmem>>, %arg4: memref<8x128xf32, #tpu.memory_space<vmem>>, %arg5: memref<16x128xf32, #tpu.memory_space<vmem>>) attributes {dimension_semantics = [#tpu.dimension_semantics<parallel>, #tpu.dimension_semantics<arbitrary>], iteration_bounds = array<i64: 1, 1>, scalar_prefetch = 0 : i64, scratch_operands = 1 : i64, tpu.core_type = #tpu.core_type<tc>, window_params = [{transform_indices = @transform_0, window_bounds = array<i64: 16, 128>}, {transform_indices = @transform_1, window_bounds = array<i64: 16, 128>}, {transform_indices = @transform_2, window_bounds = array<i64: 8, 128>}]} {
    %c0_i32 = arith.constant 0 : i32
    %0 = arith.cmpi eq, %arg1, %c0_i32 : i32
    %1 = arith.extui %0 : i1 to i32
    %c0_i32_0 = arith.constant 0 : i32
    %2 = arith.cmpi ne, %1, %c0_i32_0 : i32
    scf.if %2 {
      %cst_17 = arith.constant 0.000000e+00 : f32
      %35 = vector.broadcast %cst_17 : f32 to vector<16x128xf32>
      %c0_18 = arith.constant 0 : index
      %c0_19 = arith.constant 0 : index
      %36 = vector.load %arg5[%c0_18, %c0_19] : memref<16x128xf32, #tpu.memory_space<vmem>>, vector<16x128xf32>
      tpu.vector_store %arg5[%c0_18, %c0_19], %35 {strides = array<i32>} : memref<16x128xf32, #tpu.memory_space<vmem>>, vector<16x128xf32>,
    } else {
    }
    %c0 = arith.constant 0 : index
    %c0_1 = arith.constant 0 : index
    %3 = vector.load %arg2[%c0, %c0_1] : memref<16x128xf32, #tpu.memory_space<vmem>>, vector<16x128xf32>
    %c0_2 = arith.constant 0 : index
    %c0_3 = arith.constant 0 : index
    %4 = vector.load %arg3[%c0_2, %c0_3] : memref<16x128xf32, #tpu.memory_space<vmem>>, vector<16x128xf32>
    %5 = math.log %3 : vector<16x128xf32>
    %cst = arith.constant -1.000000e+02 : f32
    %6 = vector.broadcast %cst : f32 to vector<16x128xf32>
    %7 = arith.maximumf %5, %6 : vector<16x128xf32>
    %cst_4 = arith.constant 1.000000e+00 : f32
    %8 = vector.broadcast %cst_4 : f32 to vector<16x128xf32>
    %9 = arith.subf %8, %3 : vector<16x128xf32>
    %10 = math.log %9 : vector<16x128xf32>
    %cst_5 = arith.constant -1.000000e+02 : f32
    %11 = vector.broadcast %cst_5 : f32 to vector<16x128xf32>
    %12 = arith.maximumf %10, %11 : vector<16x128xf32>
    %13 = arith.mulf %4, %7 : vector<16x128xf32>
    %cst_6 = arith.constant 1.000000e+00 : f32
    %14 = vector.broadcast %cst_6 : f32 to vector<16x128xf32>
    %15 = arith.subf %14, %4 : vector<16x128xf32>
    %16 = arith.mulf %15, %12 : vector<16x128xf32>
    %17 = arith.addf %13, %16 : vector<16x128xf32>
    %cst_7 = arith.constant 0.000000e+00 : f32
    %18 = vector.broadcast %cst_7 : f32 to vector<16x128xf32>
    %19 = arith.subf %18, %17 : vector<16x128xf32>
    %cst_8 = arith.constant 0.000000e+00 : f32
    %20 = vector.broadcast %cst_8 : f32 to vector<16x128xf32>
    %21 = arith.subf %20, %19 : vector<16x128xf32>
    %22 = math.exp %21 : vector<16x128xf32>
    %cst_9 = arith.constant 1.000000e+00 : f32
    %23 = vector.broadcast %cst_9 : f32 to vector<16x128xf32>
    %24 = arith.subf %23, %22 : vector<16x128xf32>
    %25 = arith.mulf %24, %24 : vector<16x128xf32>
    %cst_10 = arith.constant 1.000000e+00 : f32
    %26 = vector.broadcast %cst_10 : f32 to vector<16x128xf32>
    %27 = arith.mulf %26, %25 : vector<16x128xf32>
    %28 = arith.mulf %27, %19 : vector<16x128xf32>
    %c0_11 = arith.constant 0 : index
    %c0_12 = arith.constant 0 : index
    %29 = vector.load %arg5[%c0_11, %c0_12] : memref<16x128xf32, #tpu.memory_space<vmem>>, vector<16x128xf32>
    %30 = arith.addf %29, %28 : vector<16x128xf32>
    %c0_13 = arith.constant 0 : index
    %c0_14 = arith.constant 0 : index
    %31 = vector.load %arg5[%c0_13, %c0_14] : memref<16x128xf32, #tpu.memory_space<vmem>>, vector<16x128xf32>
    tpu.vector_store %arg5[%c0_13, %c0_14], %30 {strides = array<i32>} : memref<16x128xf32, #tpu.memory_space<vmem>>, vector<16x128xf32>,
    %c0_i32_15 = arith.constant 0 : i32
    %32 = arith.cmpi eq, %arg1, %c0_i32_15 : i32
    %33 = arith.extui %32 : i1 to i32
    %c0_i32_16 = arith.constant 0 : i32
    %34 = arith.cmpi ne, %33, %c0_i32_16 : i32
    scf.if %34 {
      %c0_17 = arith.constant 0 : index
      %c0_18 = arith.constant 0 : index
      %35 = vector.load %arg5[%c0_17, %c0_18] : memref<16x128xf32, #tpu.memory_space<vmem>>, vector<16x128xf32>
      %36 = vector.shape_cast %35 : vector<16x128xf32> to vector<2x8x128xf32>
      %cst_19 = arith.constant dense<0.000000e+00> : vector<8x128xf32>
      %37 = vector.multi_reduction <add>, %36, %cst_19 [0] : vector<2x8x128xf32> to vector<8x128xf32>
      %c0_20 = arith.constant 0 : index
      %c0_21 = arith.constant 0 : index
      %38 = vector.load %arg4[%c0_20, %c0_21] : memref<8x128xf32, #tpu.memory_space<vmem>>, vector<8x128xf32>
      tpu.vector_store %arg4[%c0_20, %c0_21], %37 {strides = array<i32>} : memref<8x128xf32, #tpu.memory_space<vmem>>, vector<8x128xf32>,
    } else {
    }
    return
  }
  func.func @transform_0(%arg0: i32, %arg1: i32) -> (i32, i32) {
    %c1_i32 = arith.constant 1 : i32
    %0 = arith.muli %arg0, %c1_i32 : i32
    %1 = arith.addi %0, %arg1 : i32
    %c0_i32 = arith.constant 0 : i32
    %c0_i32_0 = arith.constant 0 : i32
    return %1, %c0_i32 : i32, i32
  }
  func.func @transform_1(%arg0: i32, %arg1: i32) -> (i32, i32) {
    %c1_i32 = arith.constant 1 : i32
    %0 = arith.muli %arg0, %c1_i32 : i32
    %1 = arith.addi %0, %arg1 : i32
    %c0_i32 = arith.constant 0 : i32
    %c0_i32_0 = arith.constant 0 : i32
    return %1, %c0_i32 : i32, i32
  }
  func.func @transform_2(%arg0: i32, %arg1: i32) -> (i32, i32) {
    %c0_i32 = arith.constant 0 : i32
    %c0_i32_0 = arith.constant 0 : i32
    return %arg0, %c0_i32 : i32, i32
  }
}

</mosaic_0001>

<bundles_post_ra>
// kernel: tpu_custom_call.1
= control target key start
LH: loop header
LB: loop body
LE: loop exit
PB: predicated region body
PF: predicated region fallthrough
CT: control target
= control target key end

     0   :  { %7 = vsyncpa [#allocation4], 0  ;;  %s239_s0 = inlined_call_operand.hbm [shape: f32[16,128], index: 0, kind: input, shape index: {}]   ;;  %s240_s1 = inlined_call_operand.hbm [shape: f32[16,128], index: 1, kind: input, shape index: {}]   ;;  %s241_s2 = inlined_call_operand.hbm [shape: f32[8,128], index: 2, kind: output, shape index: {}]  }
   0x1   :  { %8 = vsyncpa [#allocation7], 0 }
   0x2   :  { %9 = vsyncpa [#allocation5], 0  ;;  %s210_s9 = smov [#allocation3]  }
   0x3   :  { %s19_s10 = sshll.u32 %s210_s9, 4  ;;  %s20_s10 = int_to_ptr.vmem [resolvable:$true] %s19_s10 }
   0x4   :  { %s152_s11 = scalar_lea.vmem %s20_s10, 256  ;;  %p157_p1 = scmp.lt.s32.totalorder %s20_s10, %s20_s10 }
   0x5   :  { %p153_p0 = scmp.ne.s32.totalorder %s20_s10, %s152_s11  ;;  %p158_p2 = scmp.lt.s32.totalorder %s152_s11, %s152_s11 }
   0x7   :  { %p159_p3 = por %p158_p2, %p157_p1 }
   0x9   :  { %p160_p4 = pnand %p159_p3, %p153_p0 }
   0xb   :  { %163 = shalt.err (!%p160_p4)
}
   0xc   :  { %s211_s12 = smov 128   ;;  %s212_s13 = smov 8  }
   0xd   :  { %25 = dma.hbm_to_vmem [thread:$0]  %s239_s0, 256, %s20_s10, [#allocation4], %s211_s12, %s211_s12, %s212_s13  }
   0xe   :  { %s213_s16 = smov [#allocation6]  }
   0xf   :  { %s35_s17 = sshll.u32 %s213_s16, 4  ;;  %s36_s17 = int_to_ptr.vmem [resolvable:$true] %s35_s17 }
  0x10   :  { %s172_s18 = scalar_lea.vmem %s36_s17, 256  ;;  %p177_p6 = scmp.lt.s32.totalorder %s36_s17, %s36_s17 }
  0x11   :  { %p173_p5 = scmp.ne.s32.totalorder %s36_s17, %s172_s18  ;;  %p178_p7 = scmp.lt.s32.totalorder %s172_s18, %s172_s18 }
  0x13   :  { %p179_p8 = por %p178_p7, %p177_p6 }
  0x15   :  { %p180_p9 = pnand %p179_p8, %p173_p5 }
  0x17   :  { %183 = shalt.err (!%p180_p9)
}
  0x18   :  { %41 = dma.hbm_to_vmem [thread:$0]  %s240_s1, 256, %s36_s17, [#allocation7], %s211_s12, %s211_s12, %s212_s13  }
  0x19   :  { %204 = dma.done.wait [#allocation4], 256  }
  0x1a   :  { %205 = vsyncadd [#allocation4], 4294967040 }
  0x1b   :  { %206 = dma.done.wait [#allocation7], 256  }
  0x1c   :  { %207 = vsyncadd [#allocation7], 4294967040  ;;  %v58_v0 = vld [vmem:[#allocation3] sm:$0xff]  ;;  %v59_v1 = vld [vmem:[#allocation3 + $0x8] sm:$0xff]  ;;  %s214_s0 = smov [#allocation8]  }
  0x1d   :  { %132 = vlog2.f32 %v58_v0  ;;  %v68_v2 = vsub.f32 1.0, %v58_v0  ;;  %v69_v3 = vsub.f32 1.0, %v59_v1  ;;  %v60_v5 = vld [vmem:[#allocation6] sm:$0xff]  ;;  %v61_v7 = vld [vmem:[#allocation6 + $0x8] sm:$0xff]  ;;  %s117_s1 = sshll.u32 %s214_s0, 4  ;;  %s118_s1 = int_to_ptr.vmem [resolvable:$true] %s117_s1 }
  0x1e   :  { %134 = vlog2.f32 %v59_v1  ;;  %v78_v14 = vsub.f32 1.0, %v60_v5  ;;  %v79_v17 = vsub.f32 1.0, %v61_v7  ;;  %s184_s21 = scalar_lea.vmem %s118_s1, 128  ;;  %p189_p11 = scmp.lt.s32.totalorder %s118_s1, %s118_s1 }
  0x1f   :  { %136 = vlog2.f32 %v68_v2  ;;  %p185_p10 = scmp.ne.s32.totalorder %s118_s1, %s184_s21  ;;  %p190_p12 = scmp.lt.s32.totalorder %s184_s21, %s184_s21 }
  0x20   :  { %138 = vlog2.f32 %v69_v3 }
  0x21   :  { %p191_p13 = por %p190_p12, %p189_p11 }
  0x23   :  { %p192_p0 = pnand %p191_p13, %p185_p10 }
  0x2a   :  { %v133_v4 = vpop.eup %132 }
  0x2b   :  { %v135_v6 = vpop.eup %134  ;;  %v63_v8 = vmul.f32 0.6931472, %v133_v4 }
  0x2c   :  { %v137_v9 = vpop.eup %136  ;;  %v65_v10 = vmul.f32 0.6931472, %v135_v6 }
  0x2d   :  { %v139_v11 = vpop.eup %138  ;;  %v66_v12 = vmax.f32 %v63_v8, -100.0  ;;  %v71_v13 = vmul.f32 0.6931472, %v137_v9 }
  0x2e   :  { %v67_v15 = vmax.f32 %v65_v10, -100.0  ;;  %v73_v16 = vmul.f32 0.6931472, %v139_v11 }
  0x2f   :  { %v74_v18 = vmax.f32 %v71_v13, -100.0  ;;  %v76_v19 = vmul.f32 %v66_v12, %v60_v5 }
  0x30   :  { %v75_v20 = vmax.f32 %v73_v16, -100.0  ;;  %v77_v21 = vmul.f32 %v67_v15, %v61_v7 }
  0x31   :  { %v80_v22 = vmul.f32 %v78_v14, %v74_v18 }
  0x32   :  { %v81_v23 = vmul.f32 %v79_v17, %v75_v20 }
  0x33   :  { %v82_v24 = vadd.f32 %v80_v22, %v76_v19 }
  0x34   :  { %v83_v25 = vadd.f32 %v81_v23, %v77_v21 }
  0x35   :  { %v84_v26 = vsub.f32 0.0, %v82_v24 }
  0x36   :  { %v85_v27 = vsub.f32 0.0, %v83_v25 }
  0x37   :  { %v86_v28 = vsub.f32 0.0, %v84_v26 }
  0x38   :  { %v87_v29 = vsub.f32 0.0, %v85_v27 }
  0x39   :  { %v88_v30 = vmul.f32 1.442695, %v86_v28 }
  0x3a   :  { %v90_v31 = vmul.f32 1.442695, %v87_v29 }
  0x3b   :  { %140 = vpow2.f32 %v88_v30 }
  0x3c   :  { %142 = vpow2.f32 %v90_v31 }
  0x48   :  { %v141_v32 = vpop.eup %140 }
  0x49   :  { %v143_v33 = vpop.eup %142  ;;  %v92_v34 = vsub.f32 1.0, %v141_v32 }
  0x4a   :  { %v93_v35 = vsub.f32 1.0, %v143_v33 }
  0x4b   :  { %v94_v36 = vmul.f32 %v92_v34, %v92_v34 }
  0x4c   :  { %v95_v37 = vmul.f32 %v93_v35, %v93_v35 }
  0x4d   :  { %v96_v38 = vmul.f32 %v94_v36, %v84_v26 }
  0x4e   :  { %v97_v39 = vmul.f32 %v95_v37, %v85_v27 }
  0x50   :  { %v109_v40 = vadd.f32 %v97_v39, %v96_v38 }
  0x52   :  { %110 = vst [vmem:[#allocation8] sm:$0xff] %v109_v40 }
  0x53   :  { %195 = shalt.err (!%p192_p0)
}
  0x54   :  { %120 = dma.vmem_to_hbm [thread:$0]  %s118_s1, 128, %s241_s2, [#allocation5]  }
  0x55   :  { %208 = dma.done.wait [#allocation5], 128  }
  0x56   :  { %209 = vsyncadd [#allocation5], 4294967168 }
  0x57   :  { %124 = vsyncpa [#allocation4], 1 }
  0x58   :  { %125 = vsyncpa [#allocation7], 1 }
  0x59   :  { %126 = vsyncpa [#allocation5], 1 }

</bundles_post_ra>
